<compile_context>
chip_gen: v5e
topology: v5e:2x2
jax: 0.10.0
libtpu: 0.0.40
codegen_flags: <defaults>
</compile_context>

<pallas_src>
import functools

import jax
import jax.numpy as jnp
from jax.experimental import pallas as pl
from jax.experimental.pallas import tpu as pltpu


def _round_up(x, m):
    return (x + m - 1) // m * m


def _prompt_kernel(imf_ref, w1_ref, b1_ref, w2_ref, b2_ref,
                   ctx_ref, pre_ref, suf_ref, out_ref,
                   *, pre_w, ctx_dim, n_ctx, suf_w, slope):
    # One grid step == one batch tile of TB rows (partial tail tile is masked
    # by Pallas on writeback).
    x = imf_ref[...].astype(jnp.float32)                       # (TB, vis_dim)

    # meta_net.linear1 + LeakyReLU(negative_slope=0.01)
    h = jnp.dot(x, w1_ref[...], preferred_element_type=jnp.float32) + b1_ref[...]
    h = jnp.where(h >= 0, h, slope * h)

    # meta_net.linear2 -> per-image bias, computed once as (TB, ctx_dim).
    bias = jnp.dot(h, w2_ref[...], preferred_element_type=jnp.float32) + b2_ref[...]

    tb = out_ref.shape[0]

    # Direct static-slice stores into the lane-flattened (TB, T*ctx_dim) output
    # block (no in-kernel concatenate / stack).
    if pre_w > 0:
        out_ref[:, 0:pre_w] = jnp.broadcast_to(
            pre_ref[...], (tb, pre_w)).astype(out_ref.dtype)
    for j in range(n_ctx):                                      # static unroll
        lo = pre_w + j * ctx_dim
        out_ref[:, lo:lo + ctx_dim] = (
            ctx_ref[j:j + 1, :] + bias).astype(out_ref.dtype)
    if suf_w > 0:
        base = pre_w + n_ctx * ctx_dim
        out_ref[:, base:base + suf_w] = jnp.broadcast_to(
            suf_ref[...], (tb, suf_w)).astype(out_ref.dtype)


def prompt_learner_forward(im_features, params, *, tb=None, out_dtype=None,
                           vmem_budget_bytes=16 * 1024 * 1024):
    """PromptLearner_v1.forward: im_features (B, vis_dim) -> prompts (B, 1, T, ctx_dim)."""
    w1, b1, w2, b2, ctx, prefix, suffix = (
        params["w1"], params["b1"], params["w2"], params["b2"],
        params["ctx"], params["prefix"], params["suffix"],
    )
    B, vis_dim = im_features.shape
    n_ctx, ctx_dim = ctx.shape
    n_pre = prefix.shape[0]            # module always has 1 prefix token (SOS)
    n_suf = suffix.shape[0]
    T = n_pre + n_ctx + n_suf
    hidden = w1.shape[1]
    in_dtype = im_features.dtype
    out_dtype = in_dtype if out_dtype is None else jnp.dtype(out_dtype)
    in_isz = jnp.dtype(in_dtype).itemsize
    out_isz = jnp.dtype(out_dtype).itemsize

    pre_w = n_pre * ctx_dim
    ctx_w = n_ctx * ctx_dim
    suf_w = n_suf * ctx_dim
    out_w = T * ctx_dim

    # --- VMEM accounting: drives the batch tile and the scoped-VMEM limit. ---
    f32b = 4
    per_row = (2 * out_w * out_isz           # double-buffered output block
               + 2 * vis_dim * in_isz        # double-buffered input block
               + f32b * (hidden + ctx_dim)   # f32 h / bias temps
               + out_w * out_isz)            # store staging vregs
    weight_bytes = (2 * f32b * (vis_dim * hidden + hidden
                                + hidden * ctx_dim + ctx_dim
                                + n_ctx * ctx_dim)
                    + 2 * out_isz * (pre_w + suf_w))

    if tb is None:
        avail = max(vmem_budget_bytes - weight_bytes, 8 * per_row)
        tb = min(avail // per_row, 256)
    tb = max(8, (int(tb) // 8) * 8)                         # sublane-aligned
    # Keep >= 2 grid steps so both v7x TensorCores get work (harmless elsewhere).
    tb = min(tb, max(8, _round_up(pl.cdiv(B, 2), 8)))
    tb = min(tb, _round_up(B, 8))
    grid = pl.cdiv(B, tb)

    needed = weight_bytes + tb * per_row
    # Explicit scoped-VMEM limit: real footprint + 25% / 2 MiB headroom, never
    # below 16 MiB, never above 48 MiB (safe w.r.t. v7x's 64 MiB physical VMEM,
    # and well within v5e/v6e's 128 MiB).
    vmem_limit = int(min(max(needed * 5 // 4 + (2 << 20), 16 << 20), 48 << 20))

    # Batch-invariant operands, prepared once outside the kernel.
    w1f = w1.astype(jnp.float32)                            # (vis_dim, hidden)
    b1f = b1.reshape(1, hidden).astype(jnp.float32)
    w2f = w2.astype(jnp.float32)                            # (hidden, ctx_dim)
    b2f = b2.reshape(1, ctx_dim).astype(jnp.float32)
    ctx_f = ctx.astype(jnp.float32)                         # (n_ctx, ctx_dim)
    pre_flat = prefix.reshape(1, pre_w).astype(out_dtype)   # lane-flattened prefix
    suf_flat = suffix.reshape(1, suf_w).astype(out_dtype)   # lane-flattened suffix

    kernel = functools.partial(_prompt_kernel, pre_w=pre_w, ctx_dim=ctx_dim,
                               n_ctx=n_ctx, suf_w=suf_w, slope=0.01)

    flops = 2 * B * (vis_dim * hidden + hidden * ctx_dim) + 2 * B * ctx_w
    bytes_accessed = (B * vis_dim * in_isz + B * out_w * out_isz
                      + f32b * (vis_dim * hidden + hidden
                                + hidden * ctx_dim + ctx_dim + ctx_w)
                      + out_isz * (pre_w + suf_w))

    out = pl.pallas_call(
        kernel,
        out_shape=jax.ShapeDtypeStruct((B, out_w), out_dtype),
        grid_spec=pltpu.PrefetchScalarGridSpec(
            num_scalar_prefetch=0,
            grid=(grid,),
            in_specs=[
                pl.BlockSpec((tb, vis_dim), lambda i: (i, 0)),       # im_features tile
                pl.BlockSpec((vis_dim, hidden), lambda i: (0, 0)),   # W1 (in, out)
                pl.BlockSpec((1, hidden), lambda i: (0, 0)),         # b1
                pl.BlockSpec((hidden, ctx_dim), lambda i: (0, 0)),   # W2 (in, out)
                pl.BlockSpec((1, ctx_dim), lambda i: (0, 0)),        # b2
                pl.BlockSpec((n_ctx, ctx_dim), lambda i: (0, 0)),    # ctx vectors
                pl.BlockSpec((1, pre_w), lambda i: (0, 0)),          # token_prefix (flat)
                pl.BlockSpec((1, suf_w), lambda i: (0, 0)),          # token_suffix (flat)
            ],
            out_specs=pl.BlockSpec((tb, out_w), lambda i: (i, 0)),   # lane-dense output slab
        ),
        compiler_params=pltpu.CompilerParams(
            dimension_semantics=("parallel",),
            vmem_limit_bytes=vmem_limit,
        ),
        cost_estimate=pl.CostEstimate(flops=flops, transcendentals=0,
                                      bytes_accessed=int(bytes_accessed)),
    )(im_features, w1f, b1f, w2f, b2f, ctx_f, pre_flat, suf_flat)

    # PyTorch output is (B, 1, T, ctx_dim): stack of (1, T, ctx_dim) prompts.
    return out.reshape(B, T, ctx_dim)[:, None, :, :]


def _reference_forward(im_features, params):
    w1, b1, w2, b2, ctx, prefix, suffix = (
        params["w1"], params["b1"], params["w2"], params["b2"],
        params["ctx"], params["prefix"], params["suffix"],
    )
    h = im_features @ w1 + b1
    h = jnp.where(h >= 0, h, 0.01 * h)
    bias = h @ w2 + b2                                   # (B, ctx_dim)
    ctx_shifted = ctx[None, :, :] + bias[:, None, :]     # (B, n_ctx, ctx_dim)
    B = im_features.shape[0]
    pre = jnp.broadcast_to(prefix[None], (B,) + prefix.shape)
    suf = jnp.broadcast_to(suffix[None], (B,) + suffix.shape)
    prompts = jnp.concatenate([pre, ctx_shifted, suf], axis=1)
    return prompts[:, None, :, :]


if __name__ == "__main__":
    def make_params(key, vis_dim, ctx_dim, n_ctx, n_suf, dtype=jnp.float32):
        hidden = max(1, vis_dim // 16)
        ks = jax.random.split(key, 7)
        return {
            # nn.Linear weights stored pre-transposed as (in, out) for y = x @ W + b.
            "w1": (0.02 * jax.random.normal(ks[0], (vis_dim, hidden))).astype(dtype),
            "b1": (0.01 * jax.random.normal(ks[1], (1, hidden))).astype(dtype),
            "w2": (0.02 * jax.random.normal(ks[2], (hidden, ctx_dim))).astype(dtype),
            "b2": (0.01 * jax.random.normal(ks[3], (1, ctx_dim))).astype(dtype),
            # ctx_vectors ~ N(0, 0.02) as in the module's random-init branch.
            "ctx": (0.02 * jax.random.normal(ks[4], (n_ctx, ctx_dim))).astype(dtype),
            # token_prefix / token_suffix buffers (synthetic embeddings, 1 prompt squeezed).
            "prefix": jax.random.normal(ks[5], (1, ctx_dim)).astype(dtype),
            "suffix": jax.random.normal(ks[6], (n_suf, ctx_dim)).astype(dtype),
        }

    key = jax.random.PRNGKey(0)

    # Test 1: tiny shapes (single grid step; B smaller than the batch tile,
    # exercises the masked partial-block path with no host-side padding).
    B, vis_dim, ctx_dim, n_ctx, T = 2, 32, 32, 4, 8
    n_suf = T - 1 - n_ctx
    k1, k2 = jax.random.split(key)
    params = make_params(k1, vis_dim, ctx_dim, n_ctx, n_suf)
    imf = jax.random.normal(k2, (B, vis_dim), jnp.float32)
    out = jax.block_until_ready(prompt_learner_forward(imf, params))
    ref = _reference_forward(imf, params)
    assert out.shape == (B, 1, T, ctx_dim), out.shape
    assert jnp.allclose(out, ref, atol=1e-5, rtol=1e-5), "mismatch vs JAX reference (test 1)"

    # Test 2: lane-aligned ctx_dim, batch larger than tile with a ragged tail
    # (multi-step grid + masked boundary block).
    B, vis_dim, ctx_dim, n_ctx, T = 20, 64, 128, 4, 16
    n_suf = T - 1 - n_ctx
    k3, k4 = jax.random.split(jax.random.fold_in(key, 1))
    params = make_params(k3, vis_dim, ctx_dim, n_ctx, n_suf)
    imf = jax.random.normal(k4, (B, vis_dim), jnp.float32)
    out = jax.block_until_ready(prompt_learner_forward(imf, params, tb=8))
    ref = _reference_forward(imf, params)
    assert out.shape == (B, 1, T, ctx_dim), out.shape
    assert jnp.allclose(out, ref, atol=1e-5, rtol=1e-5), "mismatch vs JAX reference (test 2)"

    print("KERNEL_OK")
</pallas_src>

<mosaic_0001>
module attributes {stable_mosaic.version = 11 : i64} {
  func.func @_prompt_kernel(%arg0: i32, %arg1: memref<8x32xf32, #tpu.memory_space<vmem>>, %arg2: memref<32x2xf32, #tpu.memory_space<vmem>>, %arg3: memref<1x2xf32, #tpu.memory_space<vmem>>, %arg4: memref<2x32xf32, #tpu.memory_space<vmem>>, %arg5: memref<1x32xf32, #tpu.memory_space<vmem>>, %arg6: memref<4x32xf32, #tpu.memory_space<vmem>>, %arg7: memref<1x32xf32, #tpu.memory_space<vmem>>, %arg8: memref<1x96xf32, #tpu.memory_space<vmem>>, %arg9: memref<8x256xf32, #tpu.memory_space<vmem>>) attributes {dimension_semantics = [#tpu.dimension_semantics<parallel>], iteration_bounds = array<i64: 1>, scalar_prefetch = 0 : i64, scratch_operands = 0 : i64, tpu.core_type = #tpu.core_type<tc>, window_params = [{transform_indices = @transform_0, window_bounds = array<i64: 8, 32>}, {pipeline_mode = #tpu.pipeline_mode<synchronous>, transform_indices = @transform_1, window_bounds = array<i64: 32, 2>}, {pipeline_mode = #tpu.pipeline_mode<synchronous>, transform_indices = @transform_2, window_bounds = array<i64: 1, 2>}, {pipeline_mode = #tpu.pipeline_mode<synchronous>, transform_indices = @transform_3, window_bounds = array<i64: 2, 32>}, {pipeline_mode = #tpu.pipeline_mode<synchronous>, transform_indices = @transform_4, window_bounds = array<i64: 1, 32>}, {pipeline_mode = #tpu.pipeline_mode<synchronous>, transform_indices = @transform_5, window_bounds = array<i64: 4, 32>}, {pipeline_mode = #tpu.pipeline_mode<synchronous>, transform_indices = @transform_6, window_bounds = array<i64: 1, 32>}, {pipeline_mode = #tpu.pipeline_mode<synchronous>, transform_indices = @transform_7, window_bounds = array<i64: 1, 96>}, {transform_indices = @transform_8, window_bounds = array<i64: 8, 256>}]} {
    %c0 = arith.constant 0 : index
    %c0_0 = arith.constant 0 : index
    %0 = vector.load %arg1[%c0, %c0_0] : memref<8x32xf32, #tpu.memory_space<vmem>>, vector<8x32xf32>
    %c0_1 = arith.constant 0 : index
    %c0_2 = arith.constant 0 : index
    %1 = vector.load %arg2[%c0_1, %c0_2] : memref<32x2xf32, #tpu.memory_space<vmem>>, vector<32x2xf32>
    %cst = arith.constant dense<0.000000e+00> : vector<8x2xf32>
    %2 = tpu.matmul %0, %1, %cst {dimension_numbers = #tpu.dot_dimension_numbers<[1], [0], [0], [1], [0, 0, 1, 1], [], []>} : vector<8x32xf32>, vector<32x2xf32>, vector<8x2xf32> -> vector<8x2xf32>
    %c0_3 = arith.constant 0 : index
    %c0_4 = arith.constant 0 : index
    %3 = vector.load %arg3[%c0_3, %c0_4] : memref<1x2xf32, #tpu.memory_space<vmem>>, vector<1x2xf32>
    %4 = vector.broadcast %3 : vector<1x2xf32> to vector<8x2xf32>
    %5 = arith.addf %2, %4 : vector<8x2xf32>
    %cst_5 = arith.constant 0.000000e+00 : f32
    %6 = vector.broadcast %cst_5 : f32 to vector<8x2xf32>
    %7 = arith.cmpf oge, %5, %6 : vector<8x2xf32>
    %cst_6 = arith.constant 0.00999999977 : f32
    %8 = vector.broadcast %cst_6 : f32 to vector<8x2xf32>
    %9 = arith.mulf %8, %5 : vector<8x2xf32>
    %10 = arith.select %7, %5, %9 : vector<8x2xi1>, vector<8x2xf32>
    %c0_7 = arith.constant 0 : index
    %c0_8 = arith.constant 0 : index
    %11 = vector.load %arg4[%c0_7, %c0_8] : memref<2x32xf32, #tpu.memory_space<vmem>>, vector<2x32xf32>
    %cst_9 = arith.constant dense<0.000000e+00> : vector<8x32xf32>
    %12 = tpu.matmul %10, %11, %cst_9 {dimension_numbers = #tpu.dot_dimension_numbers<[1], [0], [0], [1], [0, 0, 1, 1], [], []>} : vector<8x2xf32>, vector<2x32xf32>, vector<8x32xf32> -> vector<8x32xf32>
    %c0_10 = arith.constant 0 : index
    %c0_11 = arith.constant 0 : index
    %13 = vector.load %arg5[%c0_10, %c0_11] : memref<1x32xf32, #tpu.memory_space<vmem>>, vector<1x32xf32>
    %14 = vector.broadcast %13 : vector<1x32xf32> to vector<8x32xf32>
    %15 = arith.addf %12, %14 : vector<8x32xf32>
    %c0_12 = arith.constant 0 : index
    %c0_13 = arith.constant 0 : index
    %16 = vector.load %arg7[%c0_12, %c0_13] : memref<1x32xf32, #tpu.memory_space<vmem>>, vector<1x32xf32>
    %17 = vector.shape_cast %16 : vector<1x32xf32> to vector<1x32xf32>
    %18 = vector.broadcast %17 : vector<1x32xf32> to vector<8x32xf32>
    %c0_14 = arith.constant 0 : index
    %c0_15 = arith.constant 0 : index
    %19 = vector.load %arg9[%c0_14, %c0_15] : memref<8x256xf32, #tpu.memory_space<vmem>>, vector<8x32xf32>
    tpu.vector_store %arg9[%c0_14, %c0_15], %18 {strides = array<i32>} : memref<8x256xf32, #tpu.memory_space<vmem>>, vector<8x32xf32>,
    %c0_16 = arith.constant 0 : index
    %c0_17 = arith.constant 0 : index
    %20 = vector.load %arg6[%c0_16, %c0_17] : memref<4x32xf32, #tpu.memory_space<vmem>>, vector<1x32xf32>
    %21 = vector.broadcast %20 : vector<1x32xf32> to vector<8x32xf32>
    %22 = arith.addf %21, %15 : vector<8x32xf32>
    %c0_18 = arith.constant 0 : index
    %c32 = arith.constant 32 : index
    %23 = vector.load %arg9[%c0_18, %c32] : memref<8x256xf32, #tpu.memory_space<vmem>>, vector<8x32xf32>
    tpu.vector_store %arg9[%c0_18, %c32], %22 {strides = array<i32>} : memref<8x256xf32, #tpu.memory_space<vmem>>, vector<8x32xf32>,
    %c1 = arith.constant 1 : index
    %c0_19 = arith.constant 0 : index
    %24 = vector.load %arg6[%c1, %c0_19] : memref<4x32xf32, #tpu.memory_space<vmem>>, vector<1x32xf32>
    %25 = vector.broadcast %24 : vector<1x32xf32> to vector<8x32xf32>
    %26 = arith.addf %25, %15 : vector<8x32xf32>
    %c0_20 = arith.constant 0 : index
    %c64 = arith.constant 64 : index
    %27 = vector.load %arg9[%c0_20, %c64] : memref<8x256xf32, #tpu.memory_space<vmem>>, vector<8x32xf32>
    tpu.vector_store %arg9[%c0_20, %c64], %26 {strides = array<i32>} : memref<8x256xf32, #tpu.memory_space<vmem>>, vector<8x32xf32>,
    %c2 = arith.constant 2 : index
    %c0_21 = arith.constant 0 : index
    %28 = vector.load %arg6[%c2, %c0_21] : memref<4x32xf32, #tpu.memory_space<vmem>>, vector<1x32xf32>
    %29 = vector.broadcast %28 : vector<1x32xf32> to vector<8x32xf32>
    %30 = arith.addf %29, %15 : vector<8x32xf32>
    %c0_22 = arith.constant 0 : index
    %c96 = arith.constant 96 : index
    %31 = vector.load %arg9[%c0_22, %c96] : memref<8x256xf32, #tpu.memory_space<vmem>>, vector<8x32xf32>
    tpu.vector_store %arg9[%c0_22, %c96], %30 {strides = array<i32>} : memref<8x256xf32, #tpu.memory_space<vmem>>, vector<8x32xf32>,
    %c3 = arith.constant 3 : index
    %c0_23 = arith.constant 0 : index
    %32 = vector.load %arg6[%c3, %c0_23] : memref<4x32xf32, #tpu.memory_space<vmem>>, vector<1x32xf32>
    %33 = vector.broadcast %32 : vector<1x32xf32> to vector<8x32xf32>
    %34 = arith.addf %33, %15 : vector<8x32xf32>
    %c0_24 = arith.constant 0 : index
    %c128 = arith.constant 128 : index
    %35 = vector.load %arg9[%c0_24, %c128] : memref<8x256xf32, #tpu.memory_space<vmem>>, vector<8x32xf32>
    tpu.vector_store %arg9[%c0_24, %c128], %34 {strides = array<i32>} : memref<8x256xf32, #tpu.memory_space<vmem>>, vector<8x32xf32>,
    %c0_25 = arith.constant 0 : index
    %c0_26 = arith.constant 0 : index
    %36 = vector.load %arg8[%c0_25, %c0_26] : memref<1x96xf32, #tpu.memory_space<vmem>>, vector<1x96xf32>
    %37 = vector.shape_cast %36 : vector<1x96xf32> to vector<1x96xf32>
    %38 = vector.broadcast %37 : vector<1x96xf32> to vector<8x96xf32>
    %c0_27 = arith.constant 0 : index
    %c160 = arith.constant 160 : index
    %39 = vector.load %arg9[%c0_27, %c160] : memref<8x256xf32, #tpu.memory_space<vmem>>, vector<8x96xf32>
    tpu.vector_store %arg9[%c0_27, %c160], %38 {strides = array<i32>} : memref<8x256xf32, #tpu.memory_space<vmem>>, vector<8x96xf32>,
    return
  }
  func.func @transform_0(%arg0: i32) -> (i32, i32) {
    %c0_i32 = arith.constant 0 : i32
    %c0_i32_0 = arith.constant 0 : i32
    return %arg0, %c0_i32 : i32, i32
  }
  func.func @transform_1(%arg0: i32) -> (i32, i32) {
    %c0_i32 = arith.constant 0 : i32
    %c0_i32_0 = arith.constant 0 : i32
    %c0_i32_1 = arith.constant 0 : i32
    return %c0_i32, %c0_i32_0 : i32, i32
  }
  func.func @transform_2(%arg0: i32) -> (i32, i32) {
    %c0_i32 = arith.constant 0 : i32
    %c0_i32_0 = arith.constant 0 : i32
    %c0_i32_1 = arith.constant 0 : i32
    return %c0_i32, %c0_i32_0 : i32, i32
  }
  func.func @transform_3(%arg0: i32) -> (i32, i32) {
    %c0_i32 = arith.constant 0 : i32
    %c0_i32_0 = arith.constant 0 : i32
    %c0_i32_1 = arith.constant 0 : i32
    return %c0_i32, %c0_i32_0 : i32, i32
  }
  func.func @transform_4(%arg0: i32) -> (i32, i32) {
    %c0_i32 = arith.constant 0 : i32
    %c0_i32_0 = arith.constant 0 : i32
    %c0_i32_1 = arith.constant 0 : i32
    return %c0_i32, %c0_i32_0 : i32, i32
  }
  func.func @transform_5(%arg0: i32) -> (i32, i32) {
    %c0_i32 = arith.constant 0 : i32
    %c0_i32_0 = arith.constant 0 : i32
    %c0_i32_1 = arith.constant 0 : i32
    return %c0_i32, %c0_i32_0 : i32, i32
  }
  func.func @transform_6(%arg0: i32) -> (i32, i32) {
    %c0_i32 = arith.constant 0 : i32
    %c0_i32_0 = arith.constant 0 : i32
    %c0_i32_1 = arith.constant 0 : i32
    return %c0_i32, %c0_i32_0 : i32, i32
  }
  func.func @transform_7(%arg0: i32) -> (i32, i32) {
    %c0_i32 = arith.constant 0 : i32
    %c0_i32_0 = arith.constant 0 : i32
    %c0_i32_1 = arith.constant 0 : i32
    return %c0_i32, %c0_i32_0 : i32, i32
  }
  func.func @transform_8(%arg0: i32) -> (i32, i32) {
    %c0_i32 = arith.constant 0 : i32
    %c0_i32_0 = arith.constant 0 : i32
    return %arg0, %c0_i32 : i32, i32
  }
}

</mosaic_0001>

<bundles_post_ra>
// kernel: tpu_custom_call.1
= control target key start
LH: loop header
LB: loop body
LE: loop exit
PB: predicated region body
PF: predicated region fallthrough
CT: control target
= control target key end

     0   :  { %13 = vsyncpa [#allocation3], 0  ;;  %vm39_vm0 = vcmask 261120   ;;  %vm75_vm1 = vcmask 1041408   ;;  %vm71_vm3 = vcmask 15360   ;;  %vm109_vm4 = vcmask 254976   ;;  %s412_s0 = inlined_call_operand.vmem [shape: f32[2,32], index: 0, kind: input, shape index: {}]   ;;  %s413_s1 = inlined_call_operand.vmem [shape: f32[32,2], index: 1, kind: input, shape index: {}]   ;;  %s414_s2 = inlined_call_operand.vmem [shape: f32[1,2], index: 2, kind: input, shape index: {}]   ;;  %s415_s3 = inlined_call_operand.vmem [shape: f32[2,32], index: 3, kind: input, shape index: {}]   ;;  %s416_s4 = inlined_call_operand.vmem [shape: f32[1,32], index: 4, kind: input, shape index: {}]   ;;  %s417_s5 = inlined_call_operand.vmem [shape: f32[4,32], index: 5, kind: input, shape index: {}]   ;;  %s418_s6 = inlined_call_operand.vmem [shape: f32[1,32], index: 6, kind: input, shape index: {}]   ;;  %s419_s7 = inlined_call_operand.vmem [shape: f32[1,96], index: 7, kind: input, shape index: {}]   ;;  %s420_s8 = inlined_call_operand.hbm [shape: f32[2,256], index: 8, kind: output, shape index: {}]  }
   0x1   :  { %v34_v0 = vld [vmem:[%s413_s1 + $0x18] sm:$0xff]  ;;  %v33_v1 = vld [vmem:[%s413_s1 + $0x10] sm:$0xff]  ;;  %v32_v2 = vld [vmem:[%s413_s1 + $0x8] sm:$0xff]  ;;  %s284_s25 = smov 64   ;;  %s285_s27 = smov 96   ;;  %vm218_vm5 = vcmask 1041664  }
   0x2   :  { %55 = vmatpush.msra.mxu0 %v34_v0  ;;  %v31_v3 = vld [vmem:[%s413_s1] sm:$0xff]  ;;  %s283_s1 = smov 32   ;;  %vm133_vm6 = vcmask 517376   ;;  %vm157_vm7 = vcmask 779776   ;;  %vm181_vm8 = vcmask 1042176  }
   0x3   :  { %v30_v4 = vld [vmem:[%s412_s0] sm:$0xff] }
   0x4   :  { %56 = vmatpush.msra.mxu0 %v33_v1  ;;  %v66_v5 = vld [vmem:[%s415_s3] sm:$0x3]  ;;  %v252_v13 = vld [vmem:[%s417_s5 + $0x3] ss:$0 sm:$0xff]  ;;  %v255_v22 = vld [vmem:[%s417_s5 + $0x2] ss:$0 sm:$0xff] }
   0x5   :  { %242 = vmatpush.msk.msra.mxu1 %vm75_vm1, %v66_v5  ;;  %v250_v6 = vld [vmem:[%s419_s7] ss:$0 sm:$0xff]  ;;  %v253_v14 = vld [vmem:[%s417_s5 + $0x1] ss:$0 sm:$0xff] }
   0x6   :  { %57 = vmatpush.msra.mxu0 %v32_v2  ;;  %206 = vrot.lane.b32.xlu0 %v250_v6, %s283_s1  ;;  %v249_v7 = vld [vmem:[%s414_s2] ss:$0 sm:$0xff]  ;;  %v205_v35 = vrot.slane %v250_v6, 6  ;;  %v204_v36 = vrot.slane %v250_v6, 4  ;;  %v203_v37 = vrot.slane %v250_v6, 2 }
   0x7   :  { %v251_v12 = vld [vmem:[%s416_s4] ss:$0 sm:$0xff] }
   0x8   :  { %58 = vmatpush.msra.mxu0 %v31_v3  ;;  %v254_v15 = vld [vmem:[%s417_s5] ss:$0 sm:$0xff] }
   0x9   :  { %241 = vmatmul.msk.f32.vlgmr.msra.gmra.mxu0 %vm39_vm0, %v30_v4  ;;  %v256_v39 = vld [vmem:[%s418_s6] ss:$0 sm:$0xff] }
   0xa   :  { %110 = vst.msk [vmem:[#allocation2] sm:$0x3] %vm109_vm4, %v256_v39  ;;  %v104_v40 = vrot.slane %v256_v39, 4  ;;  %v103_v41 = vrot.slane %v256_v39, 2  ;;  %v105_v43 = vrot.slane %v256_v39, 6 }
   0xc   :  { %112 = vst.msk [vmem:[#allocation2 + $0x8] sm:$0x3] %vm109_vm4, %v104_v40 }
   0xd   :  { %111 = vst.msk [vmem:[#allocation2 + $0x4] sm:$0x3] %vm109_vm4, %v103_v41 }
   0xe   :  { %113 = vst.msk [vmem:[#allocation2 + $0xc] sm:$0x3] %vm109_vm4, %v105_v43 }
  0x78   :  { %v207_v38 = vpop.permute.xlu0 %206 }
  0x86   :  { %v60_v8 = vpop.f32.mrf.mxu0 }
  0x87   :  { %v61_v9 = vadd.f32 %v249_v7, %v60_v8 }
  0x89   :  { %v64_v10 = vmul.f32 0.01, %v61_v9  ;;  %vm63_vm2 = vcmp.ge.f32.partialorder %v61_v9, 0.0 }
  0x8b   :  { %v65_v11 = vsel %vm63_vm2, %v61_v9, %v64_v10 }
  0x8c   :  { %243 = vmatmul.msk.f32.vlgmr.msra.gmra.mxu1 %vm71_vm3, %v65_v11 }
 0x109   :  { %v96_v16 = vpop.f32.mrf.mxu1 }
 0x10a   :  { %v97_v17 = vadd.f32 %v251_v12, %v96_v16 }
 0x10c   :  { %v188_v18 = vadd.f32 %v252_v13, %v97_v17  ;;  %v140_v19 = vadd.f32 %v253_v14, %v97_v17  ;;  %v116_v20 = vadd.f32 %v254_v15, %v97_v17  ;;  %v164_v26 = vadd.f32 %v255_v22, %v97_v17 }
 0x10e   :  { %145 = vrot.lane.b32.xlu2 %v140_v19, %s284_s25  ;;  %121 = vrot.lane.b32.xlu0 %v116_v20, %s283_s1  ;;  %v119_v21 = vrot.slane %v116_v20, 4  ;;  %196 = vst.msk [vmem:[#allocation2 + $0x2] sm:$0x3] %vm109_vm4, %v188_v18  ;;  %v191_v23 = vrot.slane %v188_v18, 4  ;;  %v190_v24 = vrot.slane %v188_v18, 2  ;;  %v192_v25 = vrot.slane %v188_v18, 6 }
 0x10f   :  { %v118_v27 = vrot.slane %v116_v20, 2  ;;  %v120_v28 = vrot.slane %v116_v20, 6  ;;  %v142_v29 = vrot.slane %v140_v19, 2  ;;  %v143_v30 = vrot.slane %v140_v19, 4  ;;  %219 = vst.msk [vmem:[#allocation2 + $0x2] sm:$0x3] %vm218_vm5, %v207_v38 }
 0x110   :  { %125 = vrot.lane.b32.xlu1 %v119_v21, %s283_s1  ;;  %198 = vst.msk [vmem:[#allocation2 + $0xa] sm:$0x3] %vm109_vm4, %v191_v23  ;;  %v144_v31 = vrot.slane %v140_v19, 6  ;;  %v168_v32 = vrot.slane %v164_v26, 6  ;;  %v166_v33 = vrot.slane %v164_v26, 2  ;;  %v167_v34 = vrot.slane %v164_v26, 4 }
 0x111   :  { %197 = vst.msk [vmem:[#allocation2 + $0x6] sm:$0x3] %vm109_vm4, %v190_v24 }
 0x112   :  { %199 = vst.msk [vmem:[#allocation2 + $0xe] sm:$0x3] %vm109_vm4, %v192_v25 }
 0x116   :  { %169 = vrot.lane.b32.xlu2 %v164_v26, %s285_s27  ;;  %123 = vrot.lane.b32.xlu0 %v118_v27, %s283_s1 }
 0x118   :  { %127 = vrot.lane.b32.xlu1 %v120_v28, %s283_s1 }
 0x11e   :  { %147 = vrot.lane.b32.xlu2 %v142_v29, %s284_s25  ;;  %149 = vrot.lane.b32.xlu0 %v143_v30, %s284_s25 }
 0x120   :  { %151 = vrot.lane.b32.xlu1 %v144_v31, %s284_s25 }
 0x126   :  { %175 = vrot.lane.b32.xlu2 %v168_v32, %s285_s27  ;;  %171 = vrot.lane.b32.xlu0 %v166_v33, %s285_s27 }
 0x128   :  { %173 = vrot.lane.b32.xlu1 %v167_v34, %s285_s27 }
 0x12e   :  { %212 = vrot.lane.b32.xlu0 %v205_v35, %s283_s1  ;;  %210 = vrot.lane.b32.xlu2 %v204_v36, %s283_s1 }
 0x130   :  { %208 = vrot.lane.b32.xlu1 %v203_v37, %s283_s1 }
 0x168   :  { %v146_v42 = vpop.permute.xlu2 %145 }
 0x170   :  { %v170_v44 = vpop.permute.xlu2 %169 }
 0x178   :  { %v148_v45 = vpop.permute.xlu2 %147 }
 0x180   :  { %v122_v46 = vpop.permute.xlu0 %121  ;;  %v176_v47 = vpop.permute.xlu2 %175 }
 0x181   :  { %134 = vst.msk [vmem:[#allocation2] sm:$0x3] %vm133_vm6, %v122_v46 }
 0x182   :  { %158 = vst.msk [vmem:[#allocation2] sm:$0x3] %vm157_vm7, %v146_v42  ;;  %v126_v48 = vpop.permute.xlu1 %125 }
 0x183   :  { %136 = vst.msk [vmem:[#allocation2 + $0x8] sm:$0x3] %vm133_vm6, %v126_v48 }
 0x184   :  { %182 = vst.msk [vmem:[#allocation2] sm:$0x3] %vm181_vm8, %v170_v44 }
 0x188   :  { %v124_v49 = vpop.permute.xlu0 %123  ;;  %v211_v50 = vpop.permute.xlu2 %210 }
 0x189   :  { %135 = vst.msk [vmem:[#allocation2 + $0x4] sm:$0x3] %vm133_vm6, %v124_v49 }
 0x18a   :  { %159 = vst.msk [vmem:[#allocation2 + $0x4] sm:$0x3] %vm157_vm7, %v148_v45  ;;  %v128_v51 = vpop.permute.xlu1 %127 }
 0x18b   :  { %137 = vst.msk [vmem:[#allocation2 + $0xc] sm:$0x3] %vm133_vm6, %v128_v51 }
 0x18c   :  { %221 = vst.msk [vmem:[#allocation2 + $0xa] sm:$0x3] %vm218_vm5, %v211_v50 }
 0x190   :  { %v150_v52 = vpop.permute.xlu0 %149 }
 0x191   :  { %160 = vst.msk [vmem:[#allocation2 + $0x8] sm:$0x3] %vm157_vm7, %v150_v52 }
 0x192   :  { %v152_v53 = vpop.permute.xlu1 %151 }
 0x193   :  { %161 = vst.msk [vmem:[#allocation2 + $0xc] sm:$0x3] %vm157_vm7, %v152_v53 }
 0x194   :  { %185 = vst.msk [vmem:[#allocation2 + $0xc] sm:$0x3] %vm181_vm8, %v176_v47 }
 0x198   :  { %v172_v54 = vpop.permute.xlu0 %171 }
 0x199   :  { %183 = vst.msk [vmem:[#allocation2 + $0x4] sm:$0x3] %vm181_vm8, %v172_v54 }
 0x19a   :  { %v174_v55 = vpop.permute.xlu1 %173 }
 0x19b   :  { %184 = vst.msk [vmem:[#allocation2 + $0x8] sm:$0x3] %vm181_vm8, %v174_v55 }
 0x1a0   :  { %v213_v56 = vpop.permute.xlu0 %212 }
 0x1a1   :  { %222 = vst.msk [vmem:[#allocation2 + $0xe] sm:$0x3] %vm218_vm5, %v213_v56 }
 0x1a2   :  { %v209_v57 = vpop.permute.xlu1 %208 }
 0x1a3   :  { %220 = vst.msk [vmem:[#allocation2 + $0x6] sm:$0x3] %vm218_vm5, %v209_v57 }
 0x1a4   :  { %226 = vsyncadd [#allocation3], 192  ;;  %s229_s30 = sshll.u32 %s420_s8, 4  ;;  %s286_s9 = smov [#allocation2]   ;;  %s230_s30 = int_to_ptr.hbm [resolvable:$true] %s229_s30 }
 0x1a5   :  { %s227_s10 = sshll.u32 %s286_s9, 4  ;;  %s287_s11 = smov 4   ;;  %s228_s10 = int_to_ptr.vmem [resolvable:$true] %s227_s10 }
 0x1a6   :  { %235 = dma.vmem_to_hbm [thread:$0]  %s228_s10, 64, %s230_s30, [#allocation3], %s284_s25, %s284_s25, %s287_s11  }
 0x1a7   :  { %281 = dma.done.wait [#allocation3], 256  }
 0x1a8   :  { %282 = vsyncadd [#allocation3], 4294967040 }
 0x1a9   :  { %240 = vsyncpa [#allocation3], 1 }

</bundles_post_ra>
